<compile_context>
chip_gen: v7x
topology: tpu7x:2x2x1
jax: 0.10.0
libtpu: 0.0.40
codegen_flags: <defaults>
</compile_context>

<pallas_src>
import functools

import jax
import jax.numpy as jnp
from jax.experimental import pallas as pl
from jax.experimental.pallas import tpu as pltpu


def _round_up(a: int, m: int) -> int:
    return (a + m - 1) // m * m


def _forward_kernel(x_ref, w_ref, b_ref, o_ref, acc_ref, *, n_valid, tile_b):
    i = pl.program_id(0)

    @pl.when(i == 0)
    def _init():
        acc_ref[...] = jnp.zeros_like(acc_ref)

    x = x_ref[...]          # (TB, IN_pad)     f32
    w = w_ref[...]          # (IN_pad, OUT_pad) f32  (= weight.T, zero padded)
    b = b_ref[...]          # (1, OUT_pad)     f32

    # v1 = self.linear(x)
    v1 = jnp.dot(x, w, preferred_element_type=jnp.float32) + b

    # v2 .. v12: elementwise bool/int chain (pure VPU work).
    v2 = v1 > 0.0
    v3 = v2.astype(jnp.int32)
    v4 = v3 + 2
    v6 = v4 - 1                                # torch .long(): int32 suffices on TPU
    v7 = v6 != 2
    v8 = jnp.logical_or(v7, v2)
    v9 = v8.astype(jnp.float32)
    v10 = v8.astype(jnp.int32) < 0
    v11 = v10.astype(jnp.float32) - 0.5
    # TODO(synk): torch raises on float & float; interpreted here as logical AND of nonzero-ness.
    v12 = jnp.logical_and(v9 != 0.0, v11 != 0.0)

    # Mask zero-padded batch rows and accumulate the batch reduction on-chip.
    row = jax.lax.broadcasted_iota(jnp.int32, v12.shape, 0) + i * tile_b
    contrib = jnp.where(jnp.logical_and(v12, row < n_valid), 1.0, 0.0)
    acc_ref[...] += jnp.sum(contrib, axis=0, keepdims=True)

    # Finalize: exp -> log applied once, on the final lane-padded (1, 128) vector.
    @pl.when(i == pl.num_programs(0) - 1)
    def _finalize():
        v13 = acc_ref[...]
        o_ref[...] = jnp.log(jnp.exp(v13))


def model_forward(x, weight, bias, *, max_batch_tile: int = 512):
    """x: (B, IN) f32, weight: (OUT, IN) f32 (PyTorch layout), bias: (OUT,) f32."""
    B, IN = x.shape
    OUT = weight.shape[0]

    IN_pad = _round_up(IN, 128)
    OUT_pad = _round_up(OUT, 128)
    TB = min(max_batch_tile, _round_up(B, 8))     # batch tile (rows per grid step)
    B_pad = _round_up(B, TB)

    x_p = jnp.pad(x.astype(jnp.float32), ((0, B_pad - B), (0, IN_pad - IN)))
    w_p = jnp.pad(weight.T.astype(jnp.float32), ((0, IN_pad - IN), (0, OUT_pad - OUT)))
    b_p = jnp.pad(bias.astype(jnp.float32).reshape(1, OUT), ((0, 0), (0, OUT_pad - OUT)))

    kernel = functools.partial(_forward_kernel, n_valid=B, tile_b=TB)
    out_padded = pl.pallas_call(
        kernel,
        out_shape=jax.ShapeDtypeStruct((1, OUT_pad), jnp.float32),
        grid_spec=pltpu.PrefetchScalarGridSpec(
            num_scalar_prefetch=0,
            grid=(B_pad // TB,),
            in_specs=[
                pl.BlockSpec((TB, IN_pad), lambda i: (i, 0)),       # stream x by batch tile
                pl.BlockSpec((IN_pad, OUT_pad), lambda i: (0, 0)),  # weight resident
                pl.BlockSpec((1, OUT_pad), lambda i: (0, 0)),       # bias resident
            ],
            out_specs=pl.BlockSpec((1, OUT_pad), lambda i: (0, 0)), # accumulator pattern
            scratch_shapes=[pltpu.VMEM((1, OUT_pad), jnp.float32)],
        ),
        compiler_params=pltpu.CompilerParams(
            dimension_semantics=("arbitrary",),   # batch axis carries the running sum
            vmem_limit_bytes=32 * 1024 * 1024,    # safe on v5e/v6e/v7x; tiles are tiny
        ),
    )(x_p, w_p, b_p)

    return out_padded[0, :OUT]


def _reference(x, weight, bias):
    v1 = x @ weight.T + bias
    v2 = v1 > 0
    v3 = v2.astype(jnp.int32)
    v4 = v3 + 2
    v6 = v4 - 1
    v7 = v6 != 2
    v8 = jnp.logical_or(v7, v2)
    v9 = v8.astype(jnp.float32)
    v10 = v8.astype(jnp.int32) < 0
    v11 = v10.astype(jnp.float32) - 0.5
    v12 = jnp.logical_and(v9 != 0.0, v11 != 0.0)
    v13 = jnp.sum(v12.astype(jnp.float32), axis=0)
    return jnp.log(jnp.exp(v13))


if __name__ == "__main__":
    key = jax.random.PRNGKey(0)
    kx, kw, kb = jax.random.split(key, 3)
    B, IN, OUT = 1, 3, 8
    x = jax.random.normal(kx, (B, IN), dtype=jnp.float32)
    bound = 1.0 / (IN ** 0.5)                      # torch.nn.Linear default init range
    weight = jax.random.uniform(kw, (OUT, IN), jnp.float32, -bound, bound)
    bias = jax.random.uniform(kb, (OUT,), jnp.float32, -bound, bound)

    out = jax.block_until_ready(model_forward(x, weight, bias))
    ref = jax.block_until_ready(_reference(x, weight, bias))

    assert out.shape == (OUT,), out.shape
    assert jnp.allclose(out, ref, atol=1e-5, rtol=1e-5), (out, ref)
    print("KERNEL_OK")
</pallas_src>

<mosaic_0001>
module attributes {stable_mosaic.version = 11 : i64} {
  func.func @_forward_kernel(%arg0: i32, %arg1: memref<8x128xf32, #tpu.memory_space<vmem>>, %arg2: memref<128x128xf32, #tpu.memory_space<vmem>>, %arg3: memref<1x128xf32, #tpu.memory_space<vmem>>, %arg4: memref<1x128xf32, #tpu.memory_space<vmem>>, %arg5: memref<1x128xf32, #tpu.memory_space<vmem>>) attributes {dimension_semantics = [#tpu.dimension_semantics<arbitrary>], iteration_bounds = array<i64: 1>, scalar_prefetch = 0 : i64, scratch_operands = 1 : i64, tpu.core_type = #tpu.core_type<tc>, window_params = [{transform_indices = @transform_0, window_bounds = array<i64: 8, 128>}, {pipeline_mode = #tpu.pipeline_mode<synchronous>, transform_indices = @transform_1, window_bounds = array<i64: 128, 128>}, {pipeline_mode = #tpu.pipeline_mode<synchronous>, transform_indices = @transform_2, window_bounds = array<i64: 1, 128>}, {pipeline_mode = #tpu.pipeline_mode<synchronous>, transform_indices = @transform_3, window_bounds = array<i64: 1, 128>}]} {
    %c0_i32 = arith.constant 0 : i32
    %0 = arith.cmpi eq, %arg0, %c0_i32 : i32
    %1 = arith.extui %0 : i1 to i32
    %c0_i32_0 = arith.constant 0 : i32
    %2 = arith.cmpi ne, %1, %c0_i32_0 : i32
    scf.if %2 {
      %cst_22 = arith.constant 0.000000e+00 : f32
      %51 = vector.broadcast %cst_22 : f32 to vector<1x128xf32>
      %c0_23 = arith.constant 0 : index
      %c0_24 = arith.constant 0 : index
      %52 = vector.load %arg5[%c0_23, %c0_24] : memref<1x128xf32, #tpu.memory_space<vmem>>, vector<1x128xf32>
      tpu.vector_store %arg5[%c0_23, %c0_24], %51 {strides = array<i32>} : memref<1x128xf32, #tpu.memory_space<vmem>>, vector<1x128xf32>,
    } else {
    }
    %c0 = arith.constant 0 : index
    %c0_1 = arith.constant 0 : index
    %3 = vector.load %arg1[%c0, %c0_1] : memref<8x128xf32, #tpu.memory_space<vmem>>, vector<8x128xf32>
    %c0_2 = arith.constant 0 : index
    %c0_3 = arith.constant 0 : index
    %4 = vector.load %arg2[%c0_2, %c0_3] : memref<128x128xf32, #tpu.memory_space<vmem>>, vector<128x128xf32>
    %c0_4 = arith.constant 0 : index
    %c0_5 = arith.constant 0 : index
    %5 = vector.load %arg3[%c0_4, %c0_5] : memref<1x128xf32, #tpu.memory_space<vmem>>, vector<1x128xf32>
    %cst = arith.constant dense<0.000000e+00> : vector<8x128xf32>
    %6 = tpu.matmul %3, %4, %cst {dimension_numbers = #tpu.dot_dimension_numbers<[1], [0], [0], [1], [0, 0, 1, 1], [], []>} : vector<8x128xf32>, vector<128x128xf32>, vector<8x128xf32> -> vector<8x128xf32>
    %7 = vector.broadcast %5 : vector<1x128xf32> to vector<8x128xf32>
    %8 = arith.addf %6, %7 : vector<8x128xf32>
    %cst_6 = arith.constant 0.000000e+00 : f32
    %9 = vector.broadcast %cst_6 : f32 to vector<8x128xf32>
    %10 = arith.cmpf ogt, %8, %9 : vector<8x128xf32>
    %11 = arith.extui %10 : vector<8x128xi1> to vector<8x128xi32>
    %c2_i32 = arith.constant 2 : i32
    %12 = vector.broadcast %c2_i32 : i32 to vector<8x128xi32>
    %13 = arith.addi %11, %12 : vector<8x128xi32>
    %c1_i32 = arith.constant 1 : i32
    %14 = vector.broadcast %c1_i32 : i32 to vector<8x128xi32>
    %15 = arith.subi %13, %14 : vector<8x128xi32>
    %c2_i32_7 = arith.constant 2 : i32
    %16 = vector.broadcast %c2_i32_7 : i32 to vector<8x128xi32>
    %17 = arith.cmpi ne, %15, %16 : vector<8x128xi32>
    %18 = arith.ori %17, %10 : vector<8x128xi1>
    %19 = arith.extui %18 : vector<8x128xi1> to vector<8x128xi32>
    %20 = arith.sitofp %19 : vector<8x128xi32> to vector<8x128xf32>
    %21 = arith.extui %18 : vector<8x128xi1> to vector<8x128xi32>
    %c0_i32_8 = arith.constant 0 : i32
    %22 = vector.broadcast %c0_i32_8 : i32 to vector<8x128xi32>
    %23 = arith.cmpi slt, %21, %22 : vector<8x128xi32>
    %24 = arith.extui %23 : vector<8x128xi1> to vector<8x128xi32>
    %25 = arith.sitofp %24 : vector<8x128xi32> to vector<8x128xf32>
    %cst_9 = arith.constant 5.000000e-01 : f32
    %26 = vector.broadcast %cst_9 : f32 to vector<8x128xf32>
    %27 = arith.subf %25, %26 : vector<8x128xf32>
    %cst_10 = arith.constant 0.000000e+00 : f32
    %28 = vector.broadcast %cst_10 : f32 to vector<8x128xf32>
    %29 = arith.cmpf one, %20, %28 : vector<8x128xf32>
    %cst_11 = arith.constant 0.000000e+00 : f32
    %30 = vector.broadcast %cst_11 : f32 to vector<8x128xf32>
    %31 = arith.cmpf one, %27, %30 : vector<8x128xf32>
    %32 = arith.andi %29, %31 : vector<8x128xi1>
    %33 = tpu.iota {dimensions = array<i32: 0>} : vector<8x128xi32>
    %c8_i32 = arith.constant 8 : i32
    %34 = arith.muli %arg0, %c8_i32 : i32
    %35 = vector.broadcast %34 : i32 to vector<8x128xi32>
    %36 = arith.addi %33, %35 : vector<8x128xi32>
    %c1_i32_12 = arith.constant 1 : i32
    %37 = vector.broadcast %c1_i32_12 : i32 to vector<8x128xi32>
    %38 = arith.cmpi slt, %36, %37 : vector<8x128xi32>
    %39 = arith.andi %32, %38 : vector<8x128xi1>
    %cst_13 = arith.constant 1.000000e+00 : f32
    %cst_14 = arith.constant 0.000000e+00 : f32
    %40 = vector.broadcast %cst_13 : f32 to vector<8x128xf32>
    %41 = vector.broadcast %cst_14 : f32 to vector<8x128xf32>
    %42 = arith.select %39, %40, %41 : vector<8x128xi1>, vector<8x128xf32>
    %c0_15 = arith.constant 0 : index
    %c0_16 = arith.constant 0 : index
    %43 = vector.load %arg5[%c0_15, %c0_16] : memref<1x128xf32, #tpu.memory_space<vmem>>, vector<1x128xf32>
    %cst_17 = arith.constant dense<0.000000e+00> : vector<128xf32>
    %44 = vector.multi_reduction <add>, %42, %cst_17 [0] : vector<8x128xf32> to vector<128xf32>
    %45 = vector.shape_cast %44 : vector<128xf32> to vector<1x128xf32>
    %46 = arith.addf %43, %45 : vector<1x128xf32>
    %c0_18 = arith.constant 0 : index
    %c0_19 = arith.constant 0 : index
    %47 = vector.load %arg5[%c0_18, %c0_19] : memref<1x128xf32, #tpu.memory_space<vmem>>, vector<1x128xf32>
    tpu.vector_store %arg5[%c0_18, %c0_19], %46 {strides = array<i32>} : memref<1x128xf32, #tpu.memory_space<vmem>>, vector<1x128xf32>,
    %c0_i32_20 = arith.constant 0 : i32
    %48 = arith.cmpi eq, %arg0, %c0_i32_20 : i32
    %49 = arith.extui %48 : i1 to i32
    %c0_i32_21 = arith.constant 0 : i32
    %50 = arith.cmpi ne, %49, %c0_i32_21 : i32
    scf.if %50 {
      %c0_22 = arith.constant 0 : index
      %c0_23 = arith.constant 0 : index
      %51 = vector.load %arg5[%c0_22, %c0_23] : memref<1x128xf32, #tpu.memory_space<vmem>>, vector<1x128xf32>
      %52 = math.exp %51 : vector<1x128xf32>
      %53 = math.log %52 : vector<1x128xf32>
      %c0_24 = arith.constant 0 : index
      %c0_25 = arith.constant 0 : index
      %54 = vector.load %arg4[%c0_24, %c0_25] : memref<1x128xf32, #tpu.memory_space<vmem>>, vector<1x128xf32>
      tpu.vector_store %arg4[%c0_24, %c0_25], %53 {strides = array<i32>} : memref<1x128xf32, #tpu.memory_space<vmem>>, vector<1x128xf32>,
    } else {
    }
    return
  }
  func.func @transform_0(%arg0: i32) -> (i32, i32) {
    %c0_i32 = arith.constant 0 : i32
    %c0_i32_0 = arith.constant 0 : i32
    return %arg0, %c0_i32 : i32, i32
  }
  func.func @transform_1(%arg0: i32) -> (i32, i32) {
    %c0_i32 = arith.constant 0 : i32
    %c0_i32_0 = arith.constant 0 : i32
    %c0_i32_1 = arith.constant 0 : i32
    return %c0_i32, %c0_i32_0 : i32, i32
  }
  func.func @transform_2(%arg0: i32) -> (i32, i32) {
    %c0_i32 = arith.constant 0 : i32
    %c0_i32_0 = arith.constant 0 : i32
    %c0_i32_1 = arith.constant 0 : i32
    return %c0_i32, %c0_i32_0 : i32, i32
  }
  func.func @transform_3(%arg0: i32) -> (i32, i32) {
    %c0_i32 = arith.constant 0 : i32
    %c0_i32_0 = arith.constant 0 : i32
    %c0_i32_1 = arith.constant 0 : i32
    return %c0_i32, %c0_i32_0 : i32, i32
  }
}

</mosaic_0001>

<bundles_post_ra>
// kernel: tpu_custom_call.1
= control target key start
LH: loop header
LB: loop body
LE: loop exit
PB: predicated region body
PF: predicated region fallthrough
CT: control target
= control target key end

     0   :  { %8 = vsyncpa [#allocation4], 0  ;;  %s443_s0 = inlined_call_operand.hbm [shape: f32[8,128], index: 0, kind: input, shape index: {}]   ;;  %s444_s1 = inlined_call_operand.hbm [shape: f32[128,128], index: 1, kind: input, shape index: {}]   ;;  %s445_s2 = inlined_call_operand.vmem [shape: f32[1,128], index: 2, kind: input, shape index: {}]   ;;  %s446_s3 = inlined_call_operand.hbm [shape: f32[1,128], index: 3, kind: output, shape index: {}]  }
   0x1   :  { %9 = vsyncpa [#allocation7], 0 }
   0x2   :  { %10 = vsyncpa [#allocation5], 0  ;;  %s363_s12 = smov [#allocation3]   ;;  %s364_s14 = smov [#allocation6]  }
   0x3   :  { %s17_s13 = sshll.u32 %s363_s12, 4  ;;  %s26_s15 = sshll.u32 %s364_s14, 4  ;;  %s18_s13 = int_to_ptr.vmem [resolvable:$true] %s17_s13  ;;  %s392_s15 = int_to_ptr.vmem [resolvable:$true] %s26_s15 }
   0x4   :  { %s291_s18 = scalar_lea.hbm %s443_s0, 128 }
   0x5   :  { %p292_p0 = scmp.ne.s32.totalorder %s443_s0, %s291_s18  ;;  %p295_p1 = scmp.lt.u32.totalorder %s291_s18, %s443_s0 }
   0x7   :  { %p297_p2 = pnand %p295_p1, %p292_p0 }
   0x9   :  { %300 = shalt.err (!%p297_p2)
}
   0xa   :  { %s301_s23 = scalar_lea.vmem %s18_s13, 128  ;;  %p306_p4 = scmp.lt.s32.totalorder %s18_s13, %s18_s13 }
   0xb   :  { %p302_p3 = scmp.ne.s32.totalorder %s18_s13, %s301_s23  ;;  %p307_p5 = scmp.lt.s32.totalorder %s301_s23, %s301_s23 }
   0xd   :  { %p308_p6 = por %p307_p5, %p306_p4 }
   0xf   :  { %p309_p7 = pnand %p308_p6, %p302_p3 }
  0x11   :  { %312 = shalt.err (!%p309_p7)
}
  0x12   :  { %20 = dma.hbm_to_vmem [thread:$0]  %s443_s0, 128, %s18_s13, [#allocation4]  }
  0x13   :  { %s313_s28 = scalar_lea.hbm %s444_s1, 2048 }
  0x14   :  { %p314_p8 = scmp.ne.s32.totalorder %s444_s1, %s313_s28  ;;  %p317_p9 = scmp.lt.u32.totalorder %s313_s28, %s444_s1 }
  0x16   :  { %p319_p10 = pnand %p317_p9, %p314_p8 }
  0x18   :  { %322 = shalt.err (!%p319_p10)
}
  0x19   :  { %s323_s6 = scalar_lea.vmem %s392_s15, 2048  ;;  %p328_p12 = scmp.lt.s32.totalorder %s392_s15, %s392_s15 }
  0x1a   :  { %p324_p11 = scmp.ne.s32.totalorder %s392_s15, %s323_s6  ;;  %p329_p13 = scmp.lt.s32.totalorder %s323_s6, %s323_s6 }
  0x1c   :  { %p330_p0 = por %p329_p13, %p328_p12 }
  0x1e   :  { %p331_p1 = pnand %p330_p0, %p324_p11 }
  0x20   :  { %334 = shalt.err (!%p331_p1)
}
  0x21   :  { %s365_s0 = smov 128   ;;  %s366_s7 = smov 8  }
  0x22   :  { %32 = dma.hbm_to_vmem [thread:$0]  %s444_s1, 2048, %s392_s15, [#allocation7], %s365_s0, %s365_s0, %s366_s7  }
  0x23   :  { %357 = dma.done.wait [#allocation4], 128  }
  0x24   :  { %358 = vsyncadd [#allocation4], 4294967168 }
  0x25   :  { %359 = dma.done.wait [#allocation7], 2048  }
  0x26   :  { %360 = vsyncadd [#allocation7], 4294965248  ;;  %v367_v0 = vmov 0.0|0.0   ;;  %v368_v1 = vmov 0.0   ;;  %vm369_vm0 = vmmov 0   ;;  %v47_v2 = vld [vmem:[#allocation6] sm:$0xff]  ;;  %v155_v35 = vlaneseq }
  0x27   :  { %254 = vmatprep.subr.bf16.mxu0 %v367_v0  ;;  %45 = vst [vmem:[#allocation2] sm:$0x1] %v368_v1  ;;  %251 = vmatprep.mubr.msk.f32.mxu0 %vm369_vm0, %v368_v1  ;;  %v48_v3 = vld [vmem:[#allocation6 + $0x8] sm:$0xff]  ;;  %v49_v4 = vld [vmem:[#allocation6 + $0x10] sm:$0xff]  ;;  %v50_v6 = vld [vmem:[#allocation6 + $0x18] sm:$0xff]  ;;  %v370_v31 = vmov 0  }
  0x28   :  { %v255_v5 = vpack.c.bf16 %v48_v3, %v47_v2  ;;  %v258_v7 = vpack.c.bf16 %v50_v6, %v49_v4  ;;  %v51_v8 = vld [vmem:[#allocation6 + $0x20] sm:$0xff]  ;;  %v52_v9 = vld [vmem:[#allocation6 + $0x28] sm:$0xff]  ;;  %v53_v11 = vld [vmem:[#allocation6 + $0x30] sm:$0xff]  ;;  %v156_v37 = vshrl.u32 %v155_v35, 7 }
  0x29   :  { %v261_v10 = vpack.c.bf16 %v52_v9, %v51_v8  ;;  %v54_v12 = vld [vmem:[#allocation6 + $0x38] sm:$0xff]  ;;  %v55_v14 = vld [vmem:[#allocation6 + $0x40] sm:$0xff]  ;;  %v56_v15 = vld [vmem:[#allocation6 + $0x48] sm:$0xff] }
  0x2a   :  { %256 = vmatpush3.bf16.msra.mxu0 %v255_v5  ;;  %v264_v13 = vpack.c.bf16 %v54_v12, %v53_v11  ;;  %v267_v16 = vpack.c.bf16 %v56_v15, %v55_v14  ;;  %v57_v17 = vld [vmem:[#allocation6 + $0x50] sm:$0xff]  ;;  %v58_v18 = vld [vmem:[#allocation6 + $0x58] sm:$0xff]  ;;  %v59_v20 = vld [vmem:[#allocation6 + $0x60] sm:$0xff]  ;;  %vm160_vm5 = vcmp.lt.s32.totalorder %v156_v37, 1 }
  0x2b   :  { %257 = vmatprep.subr.bf16.mxu0 %v367_v0  ;;  %v270_v19 = vpack.c.bf16 %v58_v18, %v57_v17  ;;  %v60_v21 = vld [vmem:[#allocation6 + $0x68] sm:$0xff]  ;;  %v61_v23 = vld [vmem:[#allocation6 + $0x70] sm:$0xff]  ;;  %v62_v24 = vld [vmem:[#allocation6 + $0x78] sm:$0xff] }
  0x2c   :  { %v273_v22 = vpack.c.bf16 %v60_v21, %v59_v20  ;;  %v276_v25 = vpack.c.bf16 %v62_v24, %v61_v23  ;;  %v46_v26 = vld [vmem:[#allocation3] sm:$0xff]  ;;  %v197_v27 = vld [vmem:[%s445_s2] ss:$0 sm:$0xff]  ;;  %s371_s2 = smov [#allocation8]  }
  0x2d   :  { %s187_s11 = sshll.u32 %s371_s2, 4  ;;  %s188_s11 = int_to_ptr.vmem [resolvable:$true] %s187_s11 }
  0x2e   :  { %259 = vmatpush3.bf16.msra.mxu0 %v258_v7  ;;  %v163_v47 = vld [vmem:[#allocation2] sm:$0x1]  ;;  %s335_s12 = scalar_lea.vmem %s188_s11, 16  ;;  %s339_s13 = scalar_lea.vmem %s188_s11, 32 }
  0x2f   :  { %260 = vmatprep.subr.bf16.mxu0 %v367_v0  ;;  %p336_p2 = scmp.ne.s32.totalorder %s188_s11, %s335_s12  ;;  %p340_p3 = scmp.lt.s32.totalorder %s188_s11, %s188_s11 }
  0x30   :  { %p341_p4 = scmp.lt.s32.totalorder %s339_s13, %s335_s12 }
  0x32   :  { %262 = vmatpush3.bf16.msra.mxu0 %v261_v10  ;;  %p342_p5 = por %p341_p4, %p340_p3 }
  0x33   :  { %263 = vmatprep.subr.bf16.mxu0 %v367_v0 }
  0x34   :  { %p343_p6 = pnand %p342_p5, %p336_p2 }
  0x36   :  { %265 = vmatpush3.bf16.msra.mxu0 %v264_v13 }
  0x37   :  { %266 = vmatprep.subr.bf16.mxu0 %v367_v0 }
  0x3a   :  { %268 = vmatpush3.bf16.msra.mxu0 %v267_v16 }
  0x3b   :  { %269 = vmatprep.subr.bf16.mxu0 %v367_v0 }
  0x3e   :  { %271 = vmatpush3.bf16.msra.mxu0 %v270_v19 }
  0x3f   :  { %272 = vmatprep.subr.bf16.mxu0 %v367_v0 }
  0x42   :  { %274 = vmatpush3.bf16.msra.mxu0 %v273_v22 }
  0x43   :  { %275 = vmatprep.subr.bf16.mxu0 %v367_v0 }
  0x46   :  { %277 = vmatpush3.bf16.msra.mxu0 %v276_v25 }
  0x49   :  { %252 = vmatmul.mubr.f32.vlgmr.msra.gmra.mrb[0].mxu0 %v46_v26 }
 0x11c   :  { %v136_v28 = vpop.f32.mrb[0].mxu0 }
 0x11d   :  { %v137_v29 = vadd.f32 %v197_v27, %v136_v28  ;;  %v253_v30 = vpop.f32.mrb[1].mxu0 }
 0x11f   :  { %vm140_vm1 = vcmp.gt.f32.partialorder %v137_v29, 0.0 }
 0x120   :  { %v141_v32 = vsel %vm140_vm1, 1, %v370_v31 }
 0x121   :  { %v142_v33 = vadd.s32 2, %v141_v32 }
 0x123   :  { %v198_v34 = vadd.s32 4294967295, %v142_v33 }
 0x125   :  { %vm144_vm2 = vcmp.ne.s32.totalorder %v198_v34, 2 }
 0x126   :  { %vm145_vm3 = vmor %vm144_vm2, %vm140_vm1 }
 0x127   :  { %v146_v36 = vsel %vm145_vm3, 1, %v370_v31  ;;  %v199_v38 = vsel %vm145_vm3, 1.0, %v368_v1 }
 0x128   :  { %vm148_vm4 = vcmp.lt.s32.totalorder %v146_v36, 0  ;;  %vm152_vm6 = vcmp.ne.f32.partialorder %v199_v38, 0.0 }
 0x129   :  { %v200_v39 = vsel %vm148_vm4, 1.0, %v368_v1 }
 0x12a   :  { %v201_v40 = vadd.f32 -0.5, %v200_v39 }
 0x12c   :  { %vm153_vm7 = vcmp.ne.f32.partialorder %v201_v40, 0.0 }
 0x12d   :  { %vm154_vm8 = vmand %vm152_vm6, %vm153_vm7 }
 0x12e   :  { %vm161_vm9 = vmand %vm154_vm8, %vm160_vm5 }
 0x12f   :  { %v162_v41 = vsel %vm161_vm9, 1.0, %v368_v1 }
 0x130   :  { %v164_v42 = vrot.slane %v162_v41, 4 }
 0x132   :  { %v165_v43 = vadd.f32 %v164_v42, %v162_v41 }
 0x134   :  { %v166_v44 = vrot.slane %v165_v43, 2 }
 0x136   :  { %v167_v45 = vadd.f32 %v166_v44, %v165_v43 }
 0x138   :  { %v168_v46 = vrot.slane %v167_v45, 1 }
 0x13a   :  { %v169_v48 = vadd.f32 %v168_v46, %v167_v45 }
 0x13c   :  { %v170_v49 = vadd.f32 %v169_v48, %v163_v47 }
 0x13e   :  { %171 = vst [vmem:[#allocation2] sm:$0x1] %v170_v49 }
 0x145   :  { %v175_v50 = vld [vmem:[#allocation2] sm:$0x1] }
 0x146   :  { %v176_v51 = vmul.f32 1.442695, %v175_v50 }
 0x148   :  { %287 = vpow2.f32 %v176_v51 }
 0x152   :  { %v288_v52 = vpop.eup %287 }
 0x153   :  { %289 = vlog2.f32 %v288_v52 }
 0x15d   :  { %v290_v53 = vpop.eup %289 }
 0x15e   :  { %v179_v54 = vmul.f32 0.6931472, %v290_v53 }
 0x160   :  { %180 = vst [vmem:[#allocation8] sm:$0x1] %v179_v54 }
 0x161   :  { %346 = shalt.err (!%p343_p6)
}
 0x162   :  { %s347_s16 = scalar_lea.hbm %s446_s3, 16 }
 0x163   :  { %p348_p7 = scmp.ne.s32.totalorder %s446_s3, %s347_s16  ;;  %p351_p8 = scmp.lt.u32.totalorder %s347_s16, %s446_s3 }
 0x165   :  { %p353_p9 = pnand %p351_p8, %p348_p7 }
 0x167   :  { %356 = shalt.err (!%p353_p9)
}
 0x168   :  { %190 = dma.vmem_to_hbm [thread:$0]  %s188_s11, 16, %s446_s3, [#allocation5]  }
 0x169   :  { %361 = dma.done.wait [#allocation5], 16  }
 0x16a   :  { %362 = vsyncadd [#allocation5], 4294967280 }
 0x16b   :  { %194 = vsyncpa [#allocation4], 1 }
 0x16c   :  { %195 = vsyncpa [#allocation7], 1 }
 0x16d   :  { %196 = vsyncpa [#allocation5], 1 }

</bundles_post_ra>
